<compile_context>
chip_gen: v6e
topology: v6e:2x2x1
jax: 0.10.0
libtpu: 0.0.40
codegen_flags: <defaults>
</compile_context>

<pallas_src>
import jax
import jax.numpy as jnp
import numpy as np
from jax import lax
from jax.experimental import pallas as pl
from jax.experimental.pallas import tpu as pltpu


# ----------------------------------------------------------------------------
# Pallas kernel: whole sequence in one invocation, state carried in registers.
# Gate order follows PyTorch: i, f, g, o (packed along the 4H lane axis).
# ----------------------------------------------------------------------------
def lstm_kernel(x_ref, wih_ref, whh_ref, b_ref, h0_ref, c0_ref,
                out_ref, hn_ref, cn_ref):
    B, S, E = x_ref.shape
    H = whh_ref.shape[0]

    wih = wih_ref[...]          # (E, 4H)
    whh = whh_ref[...]          # (H, 4H)
    bias = b_ref[...]           # (1, 4H)

    # Non-recurrent prologue: input projection for every time step.  These dots
    # are independent (no h dependency) and each produces a lane-dense (B, 4H)
    # tile, so they pipeline back-to-back through the MXU.
    xproj = [
        jnp.dot(x_ref[:, t, :], wih, preferred_element_type=jnp.float32) + bias
        for t in range(S)
    ]

    h = h0_ref[0].astype(jnp.float32)   # (B, H)
    c = c0_ref[0].astype(jnp.float32)   # (B, H)

    outs = []
    for t in range(S):
        # Single fused pre-activation: one (B,H)x(H,4H) MXU dot per step.
        pre = xproj[t] + jnp.dot(h, whh, preferred_element_type=jnp.float32)  # (B, 4H)

        sig = jax.nn.sigmoid(pre)       # i / f / o from one lane-dense pass
        i_g = sig[:, 0:H]
        f_g = sig[:, H:2 * H]
        o_g = sig[:, 3 * H:4 * H]
        g_g = jnp.tanh(pre[:, 2 * H:3 * H])

        c = f_g * c + i_g * g_g
        h = o_g * jnp.tanh(c)
        outs.append(h)

    # Bulk lane-dense store: (B, S*H); row-major order matches (B, S, H) flatten.
    out_ref[...] = jnp.concatenate(outs, axis=-1).astype(out_ref.dtype)
    hn_ref[0] = h.astype(hn_ref.dtype)
    cn_ref[0] = c.astype(cn_ref.dtype)


# ----------------------------------------------------------------------------
# Wrapper: reproduces Decoder.forward(inputs, states)
# ----------------------------------------------------------------------------
def decoder_forward(inputs, states, params):
    """inputs: (B, S, E); states = (h0, c0) each (1, B, H).
    Returns (output (B, S, H), (h_n (1,B,H), c_n (1,B,H)))."""
    wih, whh, b = params                     # (E,4H), (H,4H), (1,4H)
    h0, c0 = states
    B, S, E = inputs.shape
    H = h0.shape[-1]

    vmem = pl.BlockSpec(memory_space=pltpu.MemorySpace.VMEM)

    out_flat, h_n, c_n = pl.pallas_call(
        lstm_kernel,
        out_shape=(
            jax.ShapeDtypeStruct((B, S * H), inputs.dtype),   # lane-dense output slab
            jax.ShapeDtypeStruct((1, B, H), inputs.dtype),    # h_n
            jax.ShapeDtypeStruct((1, B, H), inputs.dtype),    # c_n
        ),
        in_specs=[vmem, vmem, vmem, vmem, vmem, vmem],
        out_specs=(vmem, vmem, vmem),
    )(inputs, wih, whh, b, h0, c0)

    output = out_flat.reshape(B, S, H)       # free, contiguous re-interpretation
    return output, (h_n, c_n)


# ----------------------------------------------------------------------------
# Deterministic parameter init (PyTorch nn.LSTM layout, uniform(-1/sqrt(H), 1/sqrt(H)))
# Packed for the kernel: W_ih -> (E, 4H), W_hh -> (H, 4H), bias -> (1, 4H),
# gate order i, f, g, o along the 4H axis (same as PyTorch row order).
# ----------------------------------------------------------------------------
def init_lstm_params(key, embedding_size, hidden_size):
    E, H = embedding_size, hidden_size
    k = 1.0 / np.sqrt(H)
    k_ih, k_hh, k_bih, k_bhh = jax.random.split(key, 4)
    w_ih = jax.random.uniform(k_ih, (4 * H, E), jnp.float32, -k, k)   # weight_ih_l0
    w_hh = jax.random.uniform(k_hh, (4 * H, H), jnp.float32, -k, k)   # weight_hh_l0
    b_ih = jax.random.uniform(k_bih, (4 * H,), jnp.float32, -k, k)
    b_hh = jax.random.uniform(k_bhh, (4 * H,), jnp.float32, -k, k)
    wih_packed = jnp.transpose(w_ih)            # (E, 4H)
    whh_packed = jnp.transpose(w_hh)            # (H, 4H)
    b_packed = (b_ih + b_hh).reshape(1, 4 * H)  # combined bias
    return wih_packed, whh_packed, b_packed


# ----------------------------------------------------------------------------
# Pure-JAX reference LSTM (same packed layout / gate order) for correctness check.
# ----------------------------------------------------------------------------
def reference_forward(inputs, states, params):
    wih, whh, b = params
    h0, c0 = states
    H = h0.shape[-1]
    x_sbe = jnp.transpose(inputs, (1, 0, 2))

    def step(carry, x_t):
        h, c = carry
        pre = x_t @ wih + h @ whh + b
        i = jax.nn.sigmoid(pre[:, 0:H])
        f = jax.nn.sigmoid(pre[:, H:2 * H])
        g = jnp.tanh(pre[:, 2 * H:3 * H])
        o = jax.nn.sigmoid(pre[:, 3 * H:4 * H])
        c_new = f * c + i * g
        h_new = o * jnp.tanh(c_new)
        return (h_new, c_new), h_new

    (hN, cN), out = lax.scan(step, (h0[0], c0[0]), x_sbe)
    return jnp.transpose(out, (1, 0, 2)), (hN[None], cN[None])


if __name__ == "__main__":
    # Small shapes consistent with the module: batch=2, seq=8, embedding=16, hidden=32
    B, S, E, H = 2, 8, 16, 32
    key = jax.random.PRNGKey(0)
    k_p, k_x, k_h, k_c = jax.random.split(key, 4)

    params = init_lstm_params(k_p, E, H)
    inputs = jax.random.normal(k_x, (B, S, E), jnp.float32)
    h0 = jax.random.normal(k_h, (1, B, H), jnp.float32)
    c0 = jax.random.normal(k_c, (1, B, H), jnp.float32)

    output, (h_n, c_n) = decoder_forward(inputs, (h0, c0), params)
    jax.block_until_ready((output, h_n, c_n))

    # Correctness check against pure-JAX reference
    ref_out, (ref_h, ref_c) = reference_forward(inputs, (h0, c0), params)
    assert output.shape == (B, S, H) and h_n.shape == (1, B, H) and c_n.shape == (1, B, H)
    np.testing.assert_allclose(np.asarray(output), np.asarray(ref_out), rtol=1e-5, atol=1e-5)
    np.testing.assert_allclose(np.asarray(h_n), np.asarray(ref_h), rtol=1e-5, atol=1e-5)
    np.testing.assert_allclose(np.asarray(c_n), np.asarray(ref_c), rtol=1e-5, atol=1e-5)

    print("KERNEL_OK")
</pallas_src>

<mosaic_0001>
module attributes {stable_mosaic.version = 11 : i64} {
  func.func @lstm_kernel(%arg0: memref<2x8x16xf32, #tpu.memory_space<vmem>>, %arg1: memref<16x128xf32, #tpu.memory_space<vmem>>, %arg2: memref<32x128xf32, #tpu.memory_space<vmem>>, %arg3: memref<1x128xf32, #tpu.memory_space<vmem>>, %arg4: memref<1x2x32xf32, #tpu.memory_space<vmem>>, %arg5: memref<1x2x32xf32, #tpu.memory_space<vmem>>, %arg6: memref<2x256xf32, #tpu.memory_space<vmem>>, %arg7: memref<1x2x32xf32, #tpu.memory_space<vmem>>, %arg8: memref<1x2x32xf32, #tpu.memory_space<vmem>>) attributes {dimension_semantics = [], scalar_prefetch = 0 : i64, scratch_operands = 0 : i64, tpu.core_type = #tpu.core_type<tc>} {
    %c0 = arith.constant 0 : index
    %c0_0 = arith.constant 0 : index
    %0 = vector.load %arg1[%c0, %c0_0] : memref<16x128xf32, #tpu.memory_space<vmem>>, vector<16x128xf32>
    %c0_1 = arith.constant 0 : index
    %c0_2 = arith.constant 0 : index
    %1 = vector.load %arg2[%c0_1, %c0_2] : memref<32x128xf32, #tpu.memory_space<vmem>>, vector<32x128xf32>
    %c0_3 = arith.constant 0 : index
    %c0_4 = arith.constant 0 : index
    %2 = vector.load %arg3[%c0_3, %c0_4] : memref<1x128xf32, #tpu.memory_space<vmem>>, vector<1x128xf32>
    %c0_5 = arith.constant 0 : index
    %c0_6 = arith.constant 0 : index
    %c0_7 = arith.constant 0 : index
    %3 = vector.load %arg0[%c0_5, %c0_6, %c0_7] : memref<2x8x16xf32, #tpu.memory_space<vmem>>, vector<2x1x16xf32>
    %4 = vector.shape_cast %3 : vector<2x1x16xf32> to vector<2x16xf32>
    %cst = arith.constant dense<0.000000e+00> : vector<2x128xf32>
    %5 = tpu.matmul %4, %0, %cst {dimension_numbers = #tpu.dot_dimension_numbers<[1], [0], [0], [1], [0, 0, 1, 1], [], []>} : vector<2x16xf32>, vector<16x128xf32>, vector<2x128xf32> -> vector<2x128xf32>
    %6 = vector.broadcast %2 : vector<1x128xf32> to vector<2x128xf32>
    %7 = arith.addf %5, %6 : vector<2x128xf32>
    %c0_8 = arith.constant 0 : index
    %c1 = arith.constant 1 : index
    %c0_9 = arith.constant 0 : index
    %8 = vector.load %arg0[%c0_8, %c1, %c0_9] : memref<2x8x16xf32, #tpu.memory_space<vmem>>, vector<2x1x16xf32>
    %9 = vector.shape_cast %8 : vector<2x1x16xf32> to vector<2x16xf32>
    %cst_10 = arith.constant dense<0.000000e+00> : vector<2x128xf32>
    %10 = tpu.matmul %9, %0, %cst_10 {dimension_numbers = #tpu.dot_dimension_numbers<[1], [0], [0], [1], [0, 0, 1, 1], [], []>} : vector<2x16xf32>, vector<16x128xf32>, vector<2x128xf32> -> vector<2x128xf32>
    %11 = vector.broadcast %2 : vector<1x128xf32> to vector<2x128xf32>
    %12 = arith.addf %10, %11 : vector<2x128xf32>
    %c0_11 = arith.constant 0 : index
    %c2 = arith.constant 2 : index
    %c0_12 = arith.constant 0 : index
    %13 = vector.load %arg0[%c0_11, %c2, %c0_12] : memref<2x8x16xf32, #tpu.memory_space<vmem>>, vector<2x1x16xf32>
    %14 = vector.shape_cast %13 : vector<2x1x16xf32> to vector<2x16xf32>
    %cst_13 = arith.constant dense<0.000000e+00> : vector<2x128xf32>
    %15 = tpu.matmul %14, %0, %cst_13 {dimension_numbers = #tpu.dot_dimension_numbers<[1], [0], [0], [1], [0, 0, 1, 1], [], []>} : vector<2x16xf32>, vector<16x128xf32>, vector<2x128xf32> -> vector<2x128xf32>
    %16 = vector.broadcast %2 : vector<1x128xf32> to vector<2x128xf32>
    %17 = arith.addf %15, %16 : vector<2x128xf32>
    %c0_14 = arith.constant 0 : index
    %c3 = arith.constant 3 : index
    %c0_15 = arith.constant 0 : index
    %18 = vector.load %arg0[%c0_14, %c3, %c0_15] : memref<2x8x16xf32, #tpu.memory_space<vmem>>, vector<2x1x16xf32>
    %19 = vector.shape_cast %18 : vector<2x1x16xf32> to vector<2x16xf32>
    %cst_16 = arith.constant dense<0.000000e+00> : vector<2x128xf32>
    %20 = tpu.matmul %19, %0, %cst_16 {dimension_numbers = #tpu.dot_dimension_numbers<[1], [0], [0], [1], [0, 0, 1, 1], [], []>} : vector<2x16xf32>, vector<16x128xf32>, vector<2x128xf32> -> vector<2x128xf32>
    %21 = vector.broadcast %2 : vector<1x128xf32> to vector<2x128xf32>
    %22 = arith.addf %20, %21 : vector<2x128xf32>
    %c0_17 = arith.constant 0 : index
    %c4 = arith.constant 4 : index
    %c0_18 = arith.constant 0 : index
    %23 = vector.load %arg0[%c0_17, %c4, %c0_18] : memref<2x8x16xf32, #tpu.memory_space<vmem>>, vector<2x1x16xf32>
    %24 = vector.shape_cast %23 : vector<2x1x16xf32> to vector<2x16xf32>
    %cst_19 = arith.constant dense<0.000000e+00> : vector<2x128xf32>
    %25 = tpu.matmul %24, %0, %cst_19 {dimension_numbers = #tpu.dot_dimension_numbers<[1], [0], [0], [1], [0, 0, 1, 1], [], []>} : vector<2x16xf32>, vector<16x128xf32>, vector<2x128xf32> -> vector<2x128xf32>
    %26 = vector.broadcast %2 : vector<1x128xf32> to vector<2x128xf32>
    %27 = arith.addf %25, %26 : vector<2x128xf32>
    %c0_20 = arith.constant 0 : index
    %c5 = arith.constant 5 : index
    %c0_21 = arith.constant 0 : index
    %28 = vector.load %arg0[%c0_20, %c5, %c0_21] : memref<2x8x16xf32, #tpu.memory_space<vmem>>, vector<2x1x16xf32>
    %29 = vector.shape_cast %28 : vector<2x1x16xf32> to vector<2x16xf32>
    %cst_22 = arith.constant dense<0.000000e+00> : vector<2x128xf32>
    %30 = tpu.matmul %29, %0, %cst_22 {dimension_numbers = #tpu.dot_dimension_numbers<[1], [0], [0], [1], [0, 0, 1, 1], [], []>} : vector<2x16xf32>, vector<16x128xf32>, vector<2x128xf32> -> vector<2x128xf32>
    %31 = vector.broadcast %2 : vector<1x128xf32> to vector<2x128xf32>
    %32 = arith.addf %30, %31 : vector<2x128xf32>
    %c0_23 = arith.constant 0 : index
    %c6 = arith.constant 6 : index
    %c0_24 = arith.constant 0 : index
    %33 = vector.load %arg0[%c0_23, %c6, %c0_24] : memref<2x8x16xf32, #tpu.memory_space<vmem>>, vector<2x1x16xf32>
    %34 = vector.shape_cast %33 : vector<2x1x16xf32> to vector<2x16xf32>
    %cst_25 = arith.constant dense<0.000000e+00> : vector<2x128xf32>
    %35 = tpu.matmul %34, %0, %cst_25 {dimension_numbers = #tpu.dot_dimension_numbers<[1], [0], [0], [1], [0, 0, 1, 1], [], []>} : vector<2x16xf32>, vector<16x128xf32>, vector<2x128xf32> -> vector<2x128xf32>
    %36 = vector.broadcast %2 : vector<1x128xf32> to vector<2x128xf32>
    %37 = arith.addf %35, %36 : vector<2x128xf32>
    %c0_26 = arith.constant 0 : index
    %c7 = arith.constant 7 : index
    %c0_27 = arith.constant 0 : index
    %38 = vector.load %arg0[%c0_26, %c7, %c0_27] : memref<2x8x16xf32, #tpu.memory_space<vmem>>, vector<2x1x16xf32>
    %39 = vector.shape_cast %38 : vector<2x1x16xf32> to vector<2x16xf32>
    %cst_28 = arith.constant dense<0.000000e+00> : vector<2x128xf32>
    %40 = tpu.matmul %39, %0, %cst_28 {dimension_numbers = #tpu.dot_dimension_numbers<[1], [0], [0], [1], [0, 0, 1, 1], [], []>} : vector<2x16xf32>, vector<16x128xf32>, vector<2x128xf32> -> vector<2x128xf32>
    %41 = vector.broadcast %2 : vector<1x128xf32> to vector<2x128xf32>
    %42 = arith.addf %40, %41 : vector<2x128xf32>
    %c0_29 = arith.constant 0 : index
    %c0_30 = arith.constant 0 : index
    %c0_31 = arith.constant 0 : index
    %43 = vector.load %arg4[%c0_29, %c0_30, %c0_31] : memref<1x2x32xf32, #tpu.memory_space<vmem>>, vector<1x2x32xf32>
    %44 = vector.shape_cast %43 : vector<1x2x32xf32> to vector<2x32xf32>
    %c0_32 = arith.constant 0 : index
    %c0_33 = arith.constant 0 : index
    %c0_34 = arith.constant 0 : index
    %45 = vector.load %arg5[%c0_32, %c0_33, %c0_34] : memref<1x2x32xf32, #tpu.memory_space<vmem>>, vector<1x2x32xf32>
    %46 = vector.shape_cast %45 : vector<1x2x32xf32> to vector<2x32xf32>
    %cst_35 = arith.constant dense<0.000000e+00> : vector<2x128xf32>
    %47 = tpu.matmul %44, %1, %cst_35 {dimension_numbers = #tpu.dot_dimension_numbers<[1], [0], [0], [1], [0, 0, 1, 1], [], []>} : vector<2x32xf32>, vector<32x128xf32>, vector<2x128xf32> -> vector<2x128xf32>
    %48 = arith.addf %7, %47 : vector<2x128xf32>
    %49 = arith.negf %48 : vector<2x128xf32>
    %50 = math.exp %49 : vector<2x128xf32>
    %cst_36 = arith.constant 1.000000e+00 : f32
    %51 = vector.broadcast %cst_36 : f32 to vector<2x128xf32>
    %52 = arith.addf %51, %50 : vector<2x128xf32>
    %53 = arith.divf %51, %52 : vector<2x128xf32>
    %54 = vector.extract_strided_slice %53 {offsets = [0, 0], sizes = [2, 32], strides = [1, 1]} : vector<2x128xf32> to vector<2x32xf32>
    %55 = vector.extract_strided_slice %53 {offsets = [0, 32], sizes = [2, 32], strides = [1, 1]} : vector<2x128xf32> to vector<2x32xf32>
    %56 = vector.extract_strided_slice %53 {offsets = [0, 96], sizes = [2, 32], strides = [1, 1]} : vector<2x128xf32> to vector<2x32xf32>
    %57 = vector.extract_strided_slice %48 {offsets = [0, 64], sizes = [2, 32], strides = [1, 1]} : vector<2x128xf32> to vector<2x32xf32>
    %58 = math.tanh %57 : vector<2x32xf32>
    %59 = arith.mulf %55, %46 : vector<2x32xf32>
    %60 = arith.mulf %54, %58 : vector<2x32xf32>
    %61 = arith.addf %59, %60 : vector<2x32xf32>
    %62 = math.tanh %61 : vector<2x32xf32>
    %63 = arith.mulf %56, %62 : vector<2x32xf32>
    %cst_37 = arith.constant dense<0.000000e+00> : vector<2x128xf32>
    %64 = tpu.matmul %63, %1, %cst_37 {dimension_numbers = #tpu.dot_dimension_numbers<[1], [0], [0], [1], [0, 0, 1, 1], [], []>} : vector<2x32xf32>, vector<32x128xf32>, vector<2x128xf32> -> vector<2x128xf32>
    %65 = arith.addf %12, %64 : vector<2x128xf32>
    %66 = arith.negf %65 : vector<2x128xf32>
    %67 = math.exp %66 : vector<2x128xf32>
    %cst_38 = arith.constant 1.000000e+00 : f32
    %68 = vector.broadcast %cst_38 : f32 to vector<2x128xf32>
    %69 = arith.addf %68, %67 : vector<2x128xf32>
    %70 = arith.divf %68, %69 : vector<2x128xf32>
    %71 = vector.extract_strided_slice %70 {offsets = [0, 0], sizes = [2, 32], strides = [1, 1]} : vector<2x128xf32> to vector<2x32xf32>
    %72 = vector.extract_strided_slice %70 {offsets = [0, 32], sizes = [2, 32], strides = [1, 1]} : vector<2x128xf32> to vector<2x32xf32>
    %73 = vector.extract_strided_slice %70 {offsets = [0, 96], sizes = [2, 32], strides = [1, 1]} : vector<2x128xf32> to vector<2x32xf32>
    %74 = vector.extract_strided_slice %65 {offsets = [0, 64], sizes = [2, 32], strides = [1, 1]} : vector<2x128xf32> to vector<2x32xf32>
    %75 = math.tanh %74 : vector<2x32xf32>
    %76 = arith.mulf %72, %61 : vector<2x32xf32>
    %77 = arith.mulf %71, %75 : vector<2x32xf32>
    %78 = arith.addf %76, %77 : vector<2x32xf32>
    %79 = math.tanh %78 : vector<2x32xf32>
    %80 = arith.mulf %73, %79 : vector<2x32xf32>
    %cst_39 = arith.constant dense<0.000000e+00> : vector<2x128xf32>
    %81 = tpu.matmul %80, %1, %cst_39 {dimension_numbers = #tpu.dot_dimension_numbers<[1], [0], [0], [1], [0, 0, 1, 1], [], []>} : vector<2x32xf32>, vector<32x128xf32>, vector<2x128xf32> -> vector<2x128xf32>
    %82 = arith.addf %17, %81 : vector<2x128xf32>
    %83 = arith.negf %82 : vector<2x128xf32>
    %84 = math.exp %83 : vector<2x128xf32>
    %cst_40 = arith.constant 1.000000e+00 : f32
    %85 = vector.broadcast %cst_40 : f32 to vector<2x128xf32>
    %86 = arith.addf %85, %84 : vector<2x128xf32>
    %87 = arith.divf %85, %86 : vector<2x128xf32>
    %88 = vector.extract_strided_slice %87 {offsets = [0, 0], sizes = [2, 32], strides = [1, 1]} : vector<2x128xf32> to vector<2x32xf32>
    %89 = vector.extract_strided_slice %87 {offsets = [0, 32], sizes = [2, 32], strides = [1, 1]} : vector<2x128xf32> to vector<2x32xf32>
    %90 = vector.extract_strided_slice %87 {offsets = [0, 96], sizes = [2, 32], strides = [1, 1]} : vector<2x128xf32> to vector<2x32xf32>
    %91 = vector.extract_strided_slice %82 {offsets = [0, 64], sizes = [2, 32], strides = [1, 1]} : vector<2x128xf32> to vector<2x32xf32>
    %92 = math.tanh %91 : vector<2x32xf32>
    %93 = arith.mulf %89, %78 : vector<2x32xf32>
    %94 = arith.mulf %88, %92 : vector<2x32xf32>
    %95 = arith.addf %93, %94 : vector<2x32xf32>
    %96 = math.tanh %95 : vector<2x32xf32>
    %97 = arith.mulf %90, %96 : vector<2x32xf32>
    %cst_41 = arith.constant dense<0.000000e+00> : vector<2x128xf32>
    %98 = tpu.matmul %97, %1, %cst_41 {dimension_numbers = #tpu.dot_dimension_numbers<[1], [0], [0], [1], [0, 0, 1, 1], [], []>} : vector<2x32xf32>, vector<32x128xf32>, vector<2x128xf32> -> vector<2x128xf32>
    %99 = arith.addf %22, %98 : vector<2x128xf32>
    %100 = arith.negf %99 : vector<2x128xf32>
    %101 = math.exp %100 : vector<2x128xf32>
    %cst_42 = arith.constant 1.000000e+00 : f32
    %102 = vector.broadcast %cst_42 : f32 to vector<2x128xf32>
    %103 = arith.addf %102, %101 : vector<2x128xf32>
    %104 = arith.divf %102, %103 : vector<2x128xf32>
    %105 = vector.extract_strided_slice %104 {offsets = [0, 0], sizes = [2, 32], strides = [1, 1]} : vector<2x128xf32> to vector<2x32xf32>
    %106 = vector.extract_strided_slice %104 {offsets = [0, 32], sizes = [2, 32], strides = [1, 1]} : vector<2x128xf32> to vector<2x32xf32>
    %107 = vector.extract_strided_slice %104 {offsets = [0, 96], sizes = [2, 32], strides = [1, 1]} : vector<2x128xf32> to vector<2x32xf32>
    %108 = vector.extract_strided_slice %99 {offsets = [0, 64], sizes = [2, 32], strides = [1, 1]} : vector<2x128xf32> to vector<2x32xf32>
    %109 = math.tanh %108 : vector<2x32xf32>
    %110 = arith.mulf %106, %95 : vector<2x32xf32>
    %111 = arith.mulf %105, %109 : vector<2x32xf32>
    %112 = arith.addf %110, %111 : vector<2x32xf32>
    %113 = math.tanh %112 : vector<2x32xf32>
    %114 = arith.mulf %107, %113 : vector<2x32xf32>
    %cst_43 = arith.constant dense<0.000000e+00> : vector<2x128xf32>
    %115 = tpu.matmul %114, %1, %cst_43 {dimension_numbers = #tpu.dot_dimension_numbers<[1], [0], [0], [1], [0, 0, 1, 1], [], []>} : vector<2x32xf32>, vector<32x128xf32>, vector<2x128xf32> -> vector<2x128xf32>
    %116 = arith.addf %27, %115 : vector<2x128xf32>
    %117 = arith.negf %116 : vector<2x128xf32>
    %118 = math.exp %117 : vector<2x128xf32>
    %cst_44 = arith.constant 1.000000e+00 : f32
    %119 = vector.broadcast %cst_44 : f32 to vector<2x128xf32>
    %120 = arith.addf %119, %118 : vector<2x128xf32>
    %121 = arith.divf %119, %120 : vector<2x128xf32>
    %122 = vector.extract_strided_slice %121 {offsets = [0, 0], sizes = [2, 32], strides = [1, 1]} : vector<2x128xf32> to vector<2x32xf32>
    %123 = vector.extract_strided_slice %121 {offsets = [0, 32], sizes = [2, 32], strides = [1, 1]} : vector<2x128xf32> to vector<2x32xf32>
    %124 = vector.extract_strided_slice %121 {offsets = [0, 96], sizes = [2, 32], strides = [1, 1]} : vector<2x128xf32> to vector<2x32xf32>
    %125 = vector.extract_strided_slice %116 {offsets = [0, 64], sizes = [2, 32], strides = [1, 1]} : vector<2x128xf32> to vector<2x32xf32>
    %126 = math.tanh %125 : vector<2x32xf32>
    %127 = arith.mulf %123, %112 : vector<2x32xf32>
    %128 = arith.mulf %122, %126 : vector<2x32xf32>
    %129 = arith.addf %127, %128 : vector<2x32xf32>
    %130 = math.tanh %129 : vector<2x32xf32>
    %131 = arith.mulf %124, %130 : vector<2x32xf32>
    %cst_45 = arith.constant dense<0.000000e+00> : vector<2x128xf32>
    %132 = tpu.matmul %131, %1, %cst_45 {dimension_numbers = #tpu.dot_dimension_numbers<[1], [0], [0], [1], [0, 0, 1, 1], [], []>} : vector<2x32xf32>, vector<32x128xf32>, vector<2x128xf32> -> vector<2x128xf32>
    %133 = arith.addf %32, %132 : vector<2x128xf32>
    %134 = arith.negf %133 : vector<2x128xf32>
    %135 = math.exp %134 : vector<2x128xf32>
    %cst_46 = arith.constant 1.000000e+00 : f32
    %136 = vector.broadcast %cst_46 : f32 to vector<2x128xf32>
    %137 = arith.addf %136, %135 : vector<2x128xf32>
    %138 = arith.divf %136, %137 : vector<2x128xf32>
    %139 = vector.extract_strided_slice %138 {offsets = [0, 0], sizes = [2, 32], strides = [1, 1]} : vector<2x128xf32> to vector<2x32xf32>
    %140 = vector.extract_strided_slice %138 {offsets = [0, 32], sizes = [2, 32], strides = [1, 1]} : vector<2x128xf32> to vector<2x32xf32>
    %141 = vector.extract_strided_slice %138 {offsets = [0, 96], sizes = [2, 32], strides = [1, 1]} : vector<2x128xf32> to vector<2x32xf32>
    %142 = vector.extract_strided_slice %133 {offsets = [0, 64], sizes = [2, 32], strides = [1, 1]} : vector<2x128xf32> to vector<2x32xf32>
    %143 = math.tanh %142 : vector<2x32xf32>
    %144 = arith.mulf %140, %129 : vector<2x32xf32>
    %145 = arith.mulf %139, %143 : vector<2x32xf32>
    %146 = arith.addf %144, %145 : vector<2x32xf32>
    %147 = math.tanh %146 : vector<2x32xf32>
    %148 = arith.mulf %141, %147 : vector<2x32xf32>
    %cst_47 = arith.constant dense<0.000000e+00> : vector<2x128xf32>
    %149 = tpu.matmul %148, %1, %cst_47 {dimension_numbers = #tpu.dot_dimension_numbers<[1], [0], [0], [1], [0, 0, 1, 1], [], []>} : vector<2x32xf32>, vector<32x128xf32>, vector<2x128xf32> -> vector<2x128xf32>
    %150 = arith.addf %37, %149 : vector<2x128xf32>
    %151 = arith.negf %150 : vector<2x128xf32>
    %152 = math.exp %151 : vector<2x128xf32>
    %cst_48 = arith.constant 1.000000e+00 : f32
    %153 = vector.broadcast %cst_48 : f32 to vector<2x128xf32>
    %154 = arith.addf %153, %152 : vector<2x128xf32>
    %155 = arith.divf %153, %154 : vector<2x128xf32>
    %156 = vector.extract_strided_slice %155 {offsets = [0, 0], sizes = [2, 32], strides = [1, 1]} : vector<2x128xf32> to vector<2x32xf32>
    %157 = vector.extract_strided_slice %155 {offsets = [0, 32], sizes = [2, 32], strides = [1, 1]} : vector<2x128xf32> to vector<2x32xf32>
    %158 = vector.extract_strided_slice %155 {offsets = [0, 96], sizes = [2, 32], strides = [1, 1]} : vector<2x128xf32> to vector<2x32xf32>
    %159 = vector.extract_strided_slice %150 {offsets = [0, 64], sizes = [2, 32], strides = [1, 1]} : vector<2x128xf32> to vector<2x32xf32>
    %160 = math.tanh %159 : vector<2x32xf32>
    %161 = arith.mulf %157, %146 : vector<2x32xf32>
    %162 = arith.mulf %156, %160 : vector<2x32xf32>
    %163 = arith.addf %161, %162 : vector<2x32xf32>
    %164 = math.tanh %163 : vector<2x32xf32>
    %165 = arith.mulf %158, %164 : vector<2x32xf32>
    %cst_49 = arith.constant dense<0.000000e+00> : vector<2x128xf32>
    %166 = tpu.matmul %165, %1, %cst_49 {dimension_numbers = #tpu.dot_dimension_numbers<[1], [0], [0], [1], [0, 0, 1, 1], [], []>} : vector<2x32xf32>, vector<32x128xf32>, vector<2x128xf32> -> vector<2x128xf32>
    %167 = arith.addf %42, %166 : vector<2x128xf32>
    %168 = arith.negf %167 : vector<2x128xf32>
    %169 = math.exp %168 : vector<2x128xf32>
    %cst_50 = arith.constant 1.000000e+00 : f32
    %170 = vector.broadcast %cst_50 : f32 to vector<2x128xf32>
    %171 = arith.addf %170, %169 : vector<2x128xf32>
    %172 = arith.divf %170, %171 : vector<2x128xf32>
    %173 = vector.extract_strided_slice %172 {offsets = [0, 0], sizes = [2, 32], strides = [1, 1]} : vector<2x128xf32> to vector<2x32xf32>
    %174 = vector.extract_strided_slice %172 {offsets = [0, 32], sizes = [2, 32], strides = [1, 1]} : vector<2x128xf32> to vector<2x32xf32>
    %175 = vector.extract_strided_slice %172 {offsets = [0, 96], sizes = [2, 32], strides = [1, 1]} : vector<2x128xf32> to vector<2x32xf32>
    %176 = vector.extract_strided_slice %167 {offsets = [0, 64], sizes = [2, 32], strides = [1, 1]} : vector<2x128xf32> to vector<2x32xf32>
    %177 = math.tanh %176 : vector<2x32xf32>
    %178 = arith.mulf %174, %163 : vector<2x32xf32>
    %179 = arith.mulf %173, %177 : vector<2x32xf32>
    %180 = arith.addf %178, %179 : vector<2x32xf32>
    %181 = math.tanh %180 : vector<2x32xf32>
    %182 = arith.mulf %175, %181 : vector<2x32xf32>
    %183 = tpu.concatenate %63, %80, %97, %114, %131, %148, %165, %182 in 1 : vector<2x32xf32>, vector<2x32xf32>, vector<2x32xf32>, vector<2x32xf32>, vector<2x32xf32>, vector<2x32xf32>, vector<2x32xf32>, vector<2x32xf32> -> vector<2x256xf32>
    %c0_51 = arith.constant 0 : index
    %c0_52 = arith.constant 0 : index
    %184 = vector.load %arg6[%c0_51, %c0_52] : memref<2x256xf32, #tpu.memory_space<vmem>>, vector<2x256xf32>
    tpu.vector_store %arg6[%c0_51, %c0_52], %183 {strides = array<i32>} : memref<2x256xf32, #tpu.memory_space<vmem>>, vector<2x256xf32>,
    %c0_53 = arith.constant 0 : index
    %c0_54 = arith.constant 0 : index
    %c0_55 = arith.constant 0 : index
    %185 = vector.load %arg7[%c0_53, %c0_54, %c0_55] : memref<1x2x32xf32, #tpu.memory_space<vmem>>, vector<1x2x32xf32>
    %186 = vector.shape_cast %185 : vector<1x2x32xf32> to vector<2x32xf32>
    %187 = vector.shape_cast %182 : vector<2x32xf32> to vector<1x2x32xf32>
    tpu.vector_store %arg7[%c0_53, %c0_54, %c0_55], %187 {strides = array<i32>} : memref<1x2x32xf32, #tpu.memory_space<vmem>>, vector<1x2x32xf32>,
    %c0_56 = arith.constant 0 : index
    %c0_57 = arith.constant 0 : index
    %c0_58 = arith.constant 0 : index
    %188 = vector.load %arg8[%c0_56, %c0_57, %c0_58] : memref<1x2x32xf32, #tpu.memory_space<vmem>>, vector<1x2x32xf32>
    %189 = vector.shape_cast %188 : vector<1x2x32xf32> to vector<2x32xf32>
    %190 = vector.shape_cast %180 : vector<2x32xf32> to vector<1x2x32xf32>
    tpu.vector_store %arg8[%c0_56, %c0_57, %c0_58], %190 {strides = array<i32>} : memref<1x2x32xf32, #tpu.memory_space<vmem>>, vector<1x2x32xf32>,
    return
  }
}

</mosaic_0001>

<bundles_post_ra>
// kernel: tpu_custom_call.1
= control target key start
LH: loop header
LB: loop body
LE: loop exit
PB: predicated region body
PF: predicated region fallthrough
CT: control target
= control target key end

     0   :  { %14 = vsyncpa [#allocation3], 0  ;;  %s2380_s0 = inlined_call_operand.hbm [shape: f32[2,8,16], index: 0, kind: input, shape index: {}]   ;;  %s2381_s1 = inlined_call_operand.hbm [shape: f32[16,128], index: 1, kind: input, shape index: {}]   ;;  %s2382_s2 = inlined_call_operand.hbm [shape: f32[32,128], index: 2, kind: input, shape index: {}]   ;;  %s2383_s3 = inlined_call_operand.vmem [shape: f32[1,128], index: 3, kind: input, shape index: {}]   ;;  %s2384_s4 = inlined_call_operand.vmem [shape: f32[1,2,32], index: 4, kind: input, shape index: {}]   ;;  %s2385_s5 = inlined_call_operand.vmem [shape: f32[1,2,32], index: 5, kind: input, shape index: {}]   ;;  %s2386_s6 = inlined_call_operand.hbm [shape: f32[2,256], index: 6, kind: output, shape index: {0}]   ;;  %s2387_s7 = inlined_call_operand.hbm [shape: f32[1,2,32], index: 7, kind: output, shape index: {1}]   ;;  %s2388_s8 = inlined_call_operand.hbm [shape: f32[1,2,32], index: 8, kind: output, shape index: {2}]  }
   0x1   :  { %15 = vsyncpa [#allocation6], 0 }
   0x2   :  { %16 = vsyncpa [#allocation4], 0 }
   0x3   :  { %17 = vsyncpa [#allocation10], 0  ;;  %s2040_s27 = smov [#allocation5]   ;;  %s2041_s29 = smov [#allocation2]  }
   0x4   :  { %s35_s28 = sshll.u32 %s2040_s27, 4  ;;  %s23_s30 = sshll.u32 %s2041_s29, 4  ;;  %s36_s28 = int_to_ptr.vmem [resolvable:$true] %s35_s28  ;;  %s24_s30 = int_to_ptr.vmem [resolvable:$true] %s23_s30 }
   0x5   :  { %s1920_s9 = scalar_lea.vmem %s36_s28, 256  ;;  %p1925_p1 = scmp.lt.s32.totalorder %s36_s28, %s36_s28 }
   0x6   :  { %p1921_p0 = scmp.ne.s32.totalorder %s36_s28, %s1920_s9  ;;  %p1926_p2 = scmp.lt.s32.totalorder %s1920_s9, %s1920_s9 }
   0x8   :  { %p1927_p3 = por %p1926_p2, %p1925_p1 }
   0xa   :  { %p1928_p4 = pnand %p1927_p3, %p1921_p0 }
   0xc   :  { %1931 = shalt.err (!%p1928_p4)
}
   0xd   :  { %s2042_s10 = smov 128   ;;  %s2043_s11 = smov 8  }
   0xe   :  { %41 = dma.hbm_to_vmem [thread:$0]  %s2381_s1, 256, %s36_s28, [#allocation6], %s2042_s10, %s2042_s10, %s2043_s11  }
   0xf   :  { %s1940_s14 = scalar_lea.vmem %s24_s30, 256  ;;  %p1945_p6 = scmp.lt.s32.totalorder %s24_s30, %s24_s30 }
  0x10   :  { %p1941_p5 = scmp.ne.s32.totalorder %s24_s30, %s1940_s14  ;;  %p1946_p7 = scmp.lt.s32.totalorder %s1940_s14, %s1940_s14 }
  0x12   :  { %p1947_p8 = por %p1946_p7, %p1945_p6 }
  0x14   :  { %p1948_p9 = pnand %p1947_p8, %p1941_p5 }
  0x16   :  { %1951 = shalt.err (!%p1948_p9)
}
  0x17   :  { %29 = dma.hbm_to_vmem [thread:$0]  %s2380_s0, 256, %s24_s30, [#allocation3], %s2042_s10, %s2042_s10, %s2043_s11  }
  0x18   :  { %s2044_s17 = smov [#allocation7]  }
  0x19   :  { %s47_s18 = sshll.u32 %s2044_s17, 4  ;;  %s48_s18 = int_to_ptr.vmem [resolvable:$true] %s47_s18 }
  0x1a   :  { %s1960_s19 = scalar_lea.vmem %s48_s18, 512  ;;  %p1965_p11 = scmp.lt.s32.totalorder %s48_s18, %s48_s18 }
  0x1b   :  { %p1961_p10 = scmp.ne.s32.totalorder %s48_s18, %s1960_s19  ;;  %p1966_p12 = scmp.lt.s32.totalorder %s1960_s19, %s1960_s19 }
  0x1d   :  { %p1967_p13 = por %p1966_p12, %p1965_p11 }
  0x1f   :  { %p1968_p0 = pnand %p1967_p13, %p1961_p10 }
  0x21   :  { %1971 = shalt.err (!%p1968_p0)
}
  0x22   :  { %53 = dma.hbm_to_vmem [thread:$0]  %s2382_s2, 512, %s48_s18, [#allocation6], %s2042_s10, %s2042_s10, %s2043_s11  }
  0x23   :  { %2032 = dma.done.wait [#allocation3], 256  }
  0x24   :  { %2033 = vsyncadd [#allocation3], 4294967040 }
  0x25   :  { %2034 = dma.done.wait [#allocation6], 768  }
  0x26   :  { %2035 = vsyncadd [#allocation6], 4294966528  ;;  %v2045_v0 = vmov 0.0   ;;  %vm2046_vm0 = vmmov 0   ;;  %v2113_v1 = vld [vmem:[#allocation5 + $0x8] sm:$0xff]  ;;  %v2115_v2 = vld [vmem:[#allocation5] sm:$0xff] }
  0x27   :  { %1691 = vmatprep.subr.mxu0 %v2045_v0  ;;  %1695 = vmatprep.mubr.msk.f32.mxu0 %vm2046_vm0, %v2045_v0  ;;  %vm87_vm1 = vcmask 1041409   ;;  %v76_v3 = vld [vmem:[#allocation2] sm:$0x1]  ;;  %v77_v4 = vld [vmem:[#allocation2 + $0x8] sm:$0x1]  ;;  %vm89_vm2 = vcmask 130048  }
  0x28   :  { %1698 = vmatprep.subr.mxu1 %v2045_v0  ;;  %1702 = vmatprep.mubr.msk.f32.mxu1 %vm2046_vm0, %v2045_v0  ;;  %v241_v5 = vld [vmem:[#allocation2 + $0xa] sm:$0x1]  ;;  %v86_v6 = vrot.slane %v77_v4, 7  ;;  %v240_v8 = vld [vmem:[#allocation2 + $0x2] sm:$0x1]  ;;  %v2148_v19 = vld [vmem:[#allocation7 + $0x18] sm:$0xff] }
  0x29   :  { %1692 = vmatpush3.msra.mxu0 %v2113_v1  ;;  %1699 = vmatpush3.msra.mxu1 %v2113_v1  ;;  %v244_v7 = vrot.slane %v241_v5, 7  ;;  %v397_v9 = vld [vmem:[#allocation2 + $0xc] sm:$0x1]  ;;  %v396_v13 = vld [vmem:[#allocation2 + $0x4] sm:$0x1]  ;;  %v2153_v20 = vld [vmem:[#allocation7 + $0x10] sm:$0xff] }
  0x2a   :  { %1693 = vmatprep.subr.mxu0 %v2045_v0  ;;  %1700 = vmatprep.subr.mxu1 %v2045_v0  ;;  %v88_v10 = vsel %vm87_vm1, %v86_v6, %v76_v3  ;;  %v400_v12 = vrot.slane %v397_v9, 7  ;;  %v553_v14 = vld [vmem:[#allocation2 + $0xe] sm:$0x1]  ;;  %v552_v17 = vld [vmem:[#allocation2 + $0x6] sm:$0x1]  ;;  %vm710_vm3 = vcmask 261120  }
  0x2b   :  { %1694 = vmatpush3.msra.mxu0 %v2115_v2  ;;  %1701 = vmatpush3.msra.mxu1 %v2115_v2  ;;  %v245_v11 = vsel %vm87_vm1, %v244_v7, %v240_v8  ;;  %v556_v16 = vrot.slane %v553_v14, 7  ;;  %v2159_v21 = vld [vmem:[#allocation7 + $0x8] sm:$0xff]  ;;  %v2163_v22 = vld [vmem:[#allocation7] sm:$0xff]  ;;  %s2047_s22 = smov 64   ;;  %s2048_s25 = smov 32   ;;  %vm1528_vm4 = vcmask 523264  }
  0x2c   :  { %1705 = vmatprep.subr.mxu0 %v2045_v0  ;;  %1712 = vmatprep.subr.mxu1 %v2045_v0  ;;  %v401_v15 = vsel %vm87_vm1, %v400_v12, %v396_v13  ;;  %v708_v23 = vld [vmem:[%s2384_s4] sm:$0x3]  ;;  %v163_v50 = vld [vmem:[#allocation2 + $0x9] sm:$0x1]  ;;  %v319_v52 = vld [vmem:[#allocation2 + $0xb] sm:$0x1] }
  0x2d   :  { %1696 = vmatmul.mubr.msk.f32.vlgmr.msra.gmra.mxu0 %vm89_vm2, %v88_v10  ;;  %v557_v18 = vsel %vm87_vm1, %v556_v16, %v552_v17  ;;  %v2192_v32 = vld [vmem:[%s2383_s3] ss:$0 sm:$0xff]  ;;  %v162_v49 = vld [vmem:[#allocation2 + $0x1] sm:$0x1]  ;;  %v166_v51 = vrot.slane %v163_v50, 7  ;;  %v322_v54 = vrot.slane %v319_v52, 7 }
  0x2e   :  { %1706 = vmatpush3.msra.mxu0 %v2113_v1  ;;  %1709 = vmatprep.mubr.msk.f32.mxu0 %vm2046_vm0, %v2045_v0  ;;  %v709_v38 = vld [vmem:[%s2385_s5] sm:$0x3]  ;;  %v318_v53 = vld [vmem:[#allocation2 + $0x3] sm:$0x1]  ;;  %v475_v55 = vld [vmem:[#allocation2 + $0xd] sm:$0x1] }
  0x2f   :  { %1707 = vmatprep.subr.mxu0 %v2045_v0  ;;  %v167_v56 = vsel %vm87_vm1, %v166_v51, %v162_v49  ;;  %v323_v57 = vsel %vm87_vm1, %v322_v54, %v318_v53  ;;  %v478_v58 = vrot.slane %v475_v55, 7  ;;  %v474_v59 = vld [vmem:[#allocation2 + $0x5] sm:$0x1]  ;;  %v631_v60 = vld [vmem:[#allocation2 + $0xf] sm:$0x1]  ;;  %s2049_s3 = smov 96  }
  0x30   :  { %1708 = vmatpush3.msra.mxu0 %v2115_v2  ;;  %1703 = vmatmul.mubr.msk.f32.vlgmr.msra.gmra.mxu1 %vm89_vm2, %v167_v56  ;;  %v634_v62 = vrot.slane %v631_v60, 7  ;;  %v630_v3 = vld [vmem:[#allocation2 + $0x7] sm:$0x1]  ;;  %vm1530_vm5 = vcmask 785408   ;;  %s2050_s5 = smov [#allocation8]   ;;  %vm1551_vm6 = vcmask 254976  }
  0x31   :  { %1710 = vmatmul.mubr.msk.f32.vlgmr.msra.gmra.mxu0 %vm89_vm2, %v245_v11  ;;  %1719 = vmatprep.subr.mxu0 %v2045_v0  ;;  %v479_v61 = vsel %vm87_vm1, %v478_v58, %v474_v59  ;;  %s1564_s26 = sshll.u32 %s2050_s5, 4  ;;  %s1565_s26 = int_to_ptr.vmem [resolvable:$true] %s1564_s26 }
  0x32   :  { %1720 = vmatpush3.msra.mxu0 %v2113_v1  ;;  %1723 = vmatprep.mubr.msk.f32.mxu0 %vm2046_vm0, %v2045_v0  ;;  %v635_v4 = vsel %vm87_vm1, %v634_v62, %v630_v3  ;;  %s1972_s27 = scalar_lea.vmem %s1565_s26, 64  ;;  %p1977_p2 = scmp.lt.s32.totalorder %s1565_s26, %s1565_s26 }
  0x33   :  { %1721 = vmatprep.subr.mxu0 %v2045_v0  ;;  %1713 = vmatpush3.msra.mxu1 %v2113_v1  ;;  %p1973_p1 = scmp.ne.s32.totalorder %s1565_s26, %s1972_s27  ;;  %p1978_p3 = scmp.lt.s32.totalorder %s1972_s27, %s1972_s27 }
  0x34   :  { %1722 = vmatpush3.msra.mxu0 %v2115_v2  ;;  %1716 = vmatprep.mubr.msk.f32.mxu1 %vm2046_vm0, %v2045_v0 }
  0x35   :  { %1724 = vmatmul.mubr.msk.f32.vlgmr.msra.gmra.mxu0 %vm89_vm2, %v401_v15  ;;  %1733 = vmatprep.subr.mxu0 %v2045_v0  ;;  %p1979_p4 = por %p1978_p3, %p1977_p2 }
  0x36   :  { %1734 = vmatpush3.msra.mxu0 %v2113_v1  ;;  %1737 = vmatprep.mubr.msk.f32.mxu0 %vm2046_vm0, %v2045_v0 }
  0x37   :  { %1735 = vmatprep.subr.mxu0 %v2045_v0  ;;  %1714 = vmatprep.subr.mxu1 %v2045_v0  ;;  %p1980_p5 = pnand %p1979_p4, %p1973_p1 }
  0x38   :  { %1736 = vmatpush3.msra.mxu0 %v2115_v2  ;;  %1715 = vmatpush3.msra.mxu1 %v2115_v2 }
  0x39   :  { %1738 = vmatmul.mubr.msk.f32.vlgmr.msra.gmra.mxu0 %vm89_vm2, %v557_v18  ;;  %1747 = vmatprep.subr.mxu0 %v2045_v0 }
  0x3a   :  { %1748 = vmatpush3.msra.mxu0 %v2148_v19  ;;  %1755 = vmatprep.mubr.msk.f32.mxu0 %vm2046_vm0, %v2045_v0 }
  0x3b   :  { %1749 = vmatprep.subr.mxu0 %v2045_v0  ;;  %1717 = vmatmul.mubr.msk.f32.vlgmr.msra.gmra.mxu1 %vm89_vm2, %v323_v57 }
  0x3c   :  { %1750 = vmatpush3.msra.mxu0 %v2153_v20  ;;  %1726 = vmatprep.subr.mxu1 %v2045_v0 }
  0x3d   :  { %1751 = vmatprep.subr.mxu0 %v2045_v0  ;;  %1727 = vmatpush3.msra.mxu1 %v2113_v1 }
  0x3e   :  { %1752 = vmatpush3.msra.mxu0 %v2159_v21  ;;  %1730 = vmatprep.mubr.msk.f32.mxu1 %vm2046_vm0, %v2045_v0 }
  0x3f   :  { %1753 = vmatprep.subr.mxu0 %v2045_v0  ;;  %1728 = vmatprep.subr.mxu1 %v2045_v0 }
  0x40   :  { %1754 = vmatpush3.msra.mxu0 %v2163_v22  ;;  %1729 = vmatpush3.msra.mxu1 %v2115_v2 }
  0x41   :  { %1756 = vmatmul.mubr.msk.f32.vlgmr.msra.gmra.mxu0 %vm710_vm3, %v708_v23  ;;  %1769 = vmatprep.subr.mxu0 %v2045_v0 }
  0x42   :  { %1770 = vmatpush3.msra.mxu0 %v2148_v19  ;;  %1777 = vmatprep.mubr.msk.f32.mxu0 %vm2046_vm0, %v2045_v0 }
  0x43   :  { %1771 = vmatprep.subr.mxu0 %v2045_v0  ;;  %1731 = vmatmul.mubr.msk.f32.vlgmr.msra.gmra.mxu1 %vm89_vm2, %v479_v61 }
  0x44   :  { %1772 = vmatpush3.msra.mxu0 %v2153_v20  ;;  %1740 = vmatprep.subr.mxu1 %v2045_v0 }
  0x45   :  { %1773 = vmatprep.subr.mxu0 %v2045_v0  ;;  %1741 = vmatpush3.msra.mxu1 %v2113_v1 }
  0x46   :  { %1774 = vmatpush3.msra.mxu0 %v2159_v21  ;;  %1744 = vmatprep.mubr.msk.f32.mxu1 %vm2046_vm0, %v2045_v0 }
  0x47   :  { %1775 = vmatprep.subr.mxu0 %v2045_v0  ;;  %1742 = vmatprep.subr.mxu1 %v2045_v0 }
  0x48   :  { %1776 = vmatpush3.msra.mxu0 %v2163_v22  ;;  %1743 = vmatpush3.msra.mxu1 %v2115_v2 }
  0x49   :  { %1791 = vmatprep.subr.mxu0 %v2045_v0  ;;  %1745 = vmatmul.mubr.msk.f32.vlgmr.msra.gmra.mxu1 %vm89_vm2, %v635_v4 }
  0x4a   :  { %1758 = vmatprep.subr.mxu1 %v2045_v0  ;;  %1766 = vmatprep.mubr.msk.f32.mxu1 %vm2046_vm0, %v2045_v0 }
  0x4b   :  { %1759 = vmatpush3.msra.mxu1 %v2148_v19 }
  0x4c   :  { %1760 = vmatprep.subr.mxu1 %v2045_v0 }
  0x4d   :  { %1761 = vmatpush3.msra.mxu1 %v2153_v20 }
  0x4e   :  { %1762 = vmatprep.subr.mxu1 %v2045_v0 }
  0x4f   :  { %1763 = vmatpush3.msra.mxu1 %v2159_v21 }
  0x50   :  { %1764 = vmatprep.subr.mxu1 %v2045_v0 }
  0x51   :  { %1765 = vmatpush3.msra.mxu1 %v2163_v22 }
  0x52   :  { %1780 = vmatprep.subr.mxu1 %v2045_v0 }
  0xed   :  { %v158_v24 = vpop.f32.mrf.mxu0 }
  0xee   :  { %v159_v33 = vadd.f32 %v2192_v32, %v158_v24 }
  0xef   :  { %v1697_v25 = vpop.f32.mrf.mxu0 }
  0xf0   :  { %v236_v5 = vpop.f32.mrf.mxu1 }
  0xf1   :  { %v2183_v26 = vpop.f32.mrf.mxu0  ;;  %v237_v14 = vadd.f32 %v2192_v32, %v236_v5 }
  0xf2   :  { %v1704_v6 = vpop.f32.mrf.mxu1 }
  0xf3   :  { %v1711_v27 = vpop.f32.mrf.mxu0 }
  0xf5   :  { %v2185_v28 = vpop.f32.mrf.mxu0 }
  0xf7   :  { %v1725_v29 = vpop.f32.mrf.mxu0 }
  0xf9   :  { %v2187_v30 = vpop.f32.mrf.mxu0 }
  0xfb   :  { %v1739_v31 = vpop.f32.mrf.mxu0  ;;  %v2242_v7 = vpop.f32.mrf.mxu1 }
  0xfc   :  { %v393_v57 = vadd.f32 %v2192_v32, %v2242_v7 }
  0xfd   :  { %v1718_v8 = vpop.f32.mrf.mxu1 }
 0x101   :  { %v780_v34 = vpop.f32.mrf.mxu0 }
 0x102   :  { %v784_v35 = vadd.f32 %v780_v34, %v159_v33 }
 0x103   :  { %v1757_v36 = vpop.f32.mrf.mxu0  ;;  %v2244_v9 = vpop.f32.mrf.mxu1 }
 0x104   :  { %1848 = vtanh.f32 %v784_v35  ;;  %v1611_v39 = vmul.f32 -1.442695, %v784_v35 }
 0x105   :  { %v1732_v10 = vpop.f32.mrf.mxu1 }
 0x106   :  { %1850 = vpow2.f32 %v1611_v39 }
 0x109   :  { %v2246_v11 = vpop.f32.mrf.mxu1 }
 0x10b   :  { %v1746_v12 = vpop.f32.mrf.mxu1 }
 0x111   :  { %v1849_v37 = vpop.eup %1848 }
 0x112   :  { %798 = vrot.lane.b32.xlu0 %v1849_v37, %s2047_s22 }
 0x113   :  { %v1851_v40 = vpop.eup %1850 }
 0x114   :  { %v788_v41 = vadd.f32 1.0, %v1851_v40  ;;  %v315_v40 = vadd.f32 %v2192_v32, %v2183_v26 }
 0x116   :  { %793 = vrot.lane.b32.xlu0 %v709_v38, %s2048_s25  ;;  %1852 = vrcp.f32 %v788_v41 }
 0x123   :  { %v1853_v42 = vpop.eup %1852 }
 0x184   :  { %v799_v43 = vpop.permute.xlu0 %798 }
 0x185   :  { %v801_v44 = vmul.f32 %v1853_v42, %v799_v43 }
 0x187   :  { %803 = vrot.lane.b32.xlu1 %v801_v44, %s2048_s25 }
 0x188   :  { %v794_v45 = vpop.permute.xlu0 %793 }
 0x189   :  { %v796_v46 = vmul.f32 %v1853_v42, %v794_v45 }
 0x1f9   :  { %v804_v47 = vpop.permute.xlu1 %803 }
 0x1fa   :  { %v2201_v48 = vadd.f32 %v804_v47, %v796_v46 }
 0x1fc   :  { %1854 = vtanh.f32 %v2201_v48 }
 0x209   :  { %v1855_v63 = vpop.eup %1854 }
 0x20a   :  { %809 = vrot.lane.b32.xlu1 %v1855_v63, %s2047_s22 }
 0x27c   :  { %v810_v1 = vpop.permute.xlu1 %809 }
 0x27d   :  { %v812_v2 = vmul.f32 %v1853_v42, %v810_v1 }
 0x27f   :  { %814 = vrot.lane.b32.xlu0 %v812_v2, %s2048_s25 }
 0x2f1   :  { %v2248_v13 = vpop.permute.xlu0 %814 }
 0x2f2   :  { %1767 = vmatmul.mubr.msk.f32.vlgmr.msra.gmra.mxu1 %vm710_vm3, %v2248_v13 }
 0x2f3   :  { %1781 = vmatpush3.msra.mxu1 %v2148_v19  ;;  %1788 = vmatprep.mubr.msk.f32.mxu1 %vm2046_vm0, %v2045_v0 }
 0x2f4   :  { %1782 = vmatprep.subr.mxu1 %v2045_v0 }
 0x2f5   :  { %1783 = vmatpush3.msra.mxu1 %v2153_v20 }
 0x2f6   :  { %1784 = vmatprep.subr.mxu1 %v2045_v0 }
 0x2f7   :  { %1785 = vmatpush3.msra.mxu1 %v2159_v21 }
 0x2f8   :  { %1786 = vmatprep.subr.mxu1 %v2045_v0 }
 0x2f9   :  { %1787 = vmatpush3.msra.mxu1 %v2163_v22 }
 0x2fa   :  { %1802 = vmatprep.subr.mxu1 %v2045_v0 }
 0x3b2   :  { %v884_v15 = vpop.f32.mrf.mxu1 }
 0x3b3   :  { %v888_v16 = vadd.f32 %v884_v15, %v237_v14  ;;  %v471_v15 = vadd.f32 %v2192_v32, %v2185_v28 }
 0x3b4   :  { %v1768_v17 = vpop.f32.mrf.mxu1 }
 0x3b5   :  { %1856 = vtanh.f32 %v888_v16  ;;  %v1613_v23 = vmul.f32 -1.442695, %v888_v16 }
 0x3b7   :  { %1858 = vpow2.f32 %v1613_v23 }
 0x3c2   :  { %v1857_v18 = vpop.eup %1856 }
 0x3c3   :  { %898 = vrot.lane.b32.xlu1 %v1857_v18, %s2047_s22 }
 0x3c4   :  { %v1859_v24 = vpop.eup %1858 }
 0x3c5   :  { %v892_v25 = vadd.f32 1.0, %v1859_v24 }
 0x3c7   :  { %1860 = vrcp.f32 %v892_v25 }
 0x3d4   :  { %v1861_v27 = vpop.eup %1860 }
 0x3d5   :  { %v896_v33 = vmul.f32 %v1861_v27, %v2201_v48 }
 0x435   :  { %v899_v29 = vpop.permute.xlu1 %898 }
 0x436   :  { %v901_v31 = vmul.f32 %v1861_v27, %v899_v29 }
 0x438   :  { %903 = vrot.lane.b32.xlu0 %v901_v31, %s2048_s25 }
 0x4aa   :  { %v904_v34 = vpop.permute.xlu0 %903 }
 0x4ab   :  { %v906_v35 = vadd.f32 %v904_v34, %v896_v33 }
 0x4ad   :  { %1862 = vtanh.f32 %v906_v35 }
 0x4ba   :  { %v1863_v36 = vpop.eup %1862 }
 0x4bb   :  { %909 = vrot.lane.b32.xlu1 %v1863_v36, %s2047_s22 }
 0x52d   :  { %v910_v37 = vpop.permute.xlu1 %909 }
 0x52e   :  { %v2267_v38 = vmul.f32 %v1861_v27, %v910_v37 }
 0x530   :  { %914 = vrot.lane.b32.xlu0 %v2267_v38, %s2048_s25 }
 0x5a2   :  { %v915_v39 = vpop.permute.xlu0 %914 }
 0x5a3   :  { %1778 = vmatmul.mubr.msk.f32.vlgmr.msra.gmra.mxu0 %vm710_vm3, %v915_v39 }
 0x5a4   :  { %1792 = vmatpush3.msra.mxu0 %v2148_v19  ;;  %1799 = vmatprep.mubr.msk.f32.mxu0 %vm2046_vm0, %v2045_v0 }
 0x5a5   :  { %1793 = vmatprep.subr.mxu0 %v2045_v0 }
 0x5a6   :  { %1794 = vmatpush3.msra.mxu0 %v2153_v20 }
 0x5a7   :  { %1795 = vmatprep.subr.mxu0 %v2045_v0 }
 0x5a8   :  { %1796 = vmatpush3.msra.mxu0 %v2159_v21 }
 0x5a9   :  { %1797 = vmatprep.subr.mxu0 %v2045_v0 }
 0x5aa   :  { %1798 = vmatpush3.msra.mxu0 %v2163_v22 }
 0x5ab   :  { %1813 = vmatprep.subr.mxu0 %v2045_v0 }
 0x663   :  { %v984_v41 = vpop.f32.mrf.mxu0 }
 0x664   :  { %v988_v42 = vadd.f32 %v984_v41, %v315_v40  ;;  %v549_v41 = vadd.f32 %v2192_v32, %v2244_v9 }
 0x665   :  { %v1779_v43 = vpop.f32.mrf.mxu0 }
 0x666   :  { %1864 = vtanh.f32 %v988_v42  ;;  %v1615_v45 = vmul.f32 -1.442695, %v988_v42 }
 0x668   :  { %1866 = vpow2.f32 %v1615_v45 }
 0x673   :  { %v1865_v44 = vpop.eup %1864 }
 0x674   :  { %998 = vrot.lane.b32.xlu1 %v1865_v44, %s2047_s22 }
 0x675   :  { %v1867_v46 = vpop.eup %1866 }
 0x676   :  { %v992_v47 = vadd.f32 1.0, %v1867_v46 }
 0x678   :  { %1868 = vrcp.f32 %v992_v47 }
 0x685   :  { %v1869_v48 = vpop.eup %1868 }
 0x686   :  { %v996_v51 = vmul.f32 %v1869_v48, %v906_v35 }
 0x6e6   :  { %v999_v49 = vpop.permute.xlu1 %998 }
 0x6e7   :  { %v1001_v50 = vmul.f32 %v1869_v48, %v999_v49 }
 0x6e9   :  { %1003 = vrot.lane.b32.xlu0 %v1001_v50, %s2048_s25 }
 0x75b   :  { %v1004_v52 = vpop.permute.xlu0 %1003 }
 0x75c   :  { %v1006_v26 = vadd.f32 %v1004_v52, %v996_v51 }
 0x75e   :  { %1870 = vtanh.f32 %v1006_v26 }
 0x76b   :  { %v1871_v53 = vpop.eup %1870 }
 0x76c   :  { %1009 = vrot.lane.b32.xlu1 %v1871_v53, %s2047_s22 }
 0x7de   :  { %v1010_v54 = vpop.permute.xlu1 %1009 }
 0x7df   :  { %v2287_v55 = vmul.f32 %v1869_v48, %v1010_v54 }
 0x7e1   :  { %1014 = vrot.lane.b32.xlu0 %v2287_v55, %s2048_s25 }
 0x853   :  { %v1015_v56 = vpop.permute.xlu0 %1014 }
 0x854   :  { %1789 = vmatmul.mubr.msk.f32.vlgmr.msra.gmra.mxu1 %vm710_vm3, %v1015_v56 }
 0x855   :  { %1803 = vmatpush3.msra.mxu1 %v2148_v19  ;;  %1810 = vmatprep.mubr.msk.f32.mxu1 %vm2046_vm0, %v2045_v0 }
 0x856   :  { %1804 = vmatprep.subr.mxu1 %v2045_v0 }
 0x857   :  { %1805 = vmatpush3.msra.mxu1 %v2153_v20 }
 0x858   :  { %1806 = vmatprep.subr.mxu1 %v2045_v0 }
 0x859   :  { %1807 = vmatpush3.msra.mxu1 %v2159_v21 }
 0x85a   :  { %1808 = vmatprep.subr.mxu1 %v2045_v0 }
 0x85b   :  { %1809 = vmatpush3.msra.mxu1 %v2163_v22 }
 0x85c   :  { %1824 = vmatprep.subr.mxu1 %v2045_v0 }
 0x914   :  { %v1084_v58 = vpop.f32.mrf.mxu1 }
 0x915   :  { %v1088_v59 = vadd.f32 %v1084_v58, %v393_v57 }
 0x916   :  { %v1790_v60 = vpop.f32.mrf.mxu1 }
 0x917   :  { %1872 = vtanh.f32 %v1088_v59  ;;  %v1617_v62 = vmul.f32 -1.442695, %v1088_v59 }
 0x919   :  { %1874 = vpow2.f32 %v1617_v62 }
 0x924   :  { %v1873_v61 = vpop.eup %1872 }
 0x925   :  { %1098 = vrot.lane.b32.xlu1 %v1873_v61, %s2047_s22 }
 0x926   :  { %v1875_v63 = vpop.eup %1874 }
 0x927   :  { %v1092_v3 = vadd.f32 1.0, %v1875_v63 }
 0x929   :  { %1876 = vrcp.f32 %v1092_v3 }
 0x936   :  { %v1877_v4 = vpop.eup %1876 }
 0x937   :  { %v1096_v5 = vmul.f32 %v1877_v4, %v1006_v26  ;;  %v627_v26 = vadd.f32 %v2192_v32, %v2187_v30 }
 0x997   :  { %v1099_v1 = vpop.permute.xlu1 %1098 }
 0x998   :  { %v1101_v2 = vmul.f32 %v1877_v4, %v1099_v1 }
 0x99a   :  { %1103 = vrot.lane.b32.xlu0 %v1101_v2, %s2048_s25 }
 0xa0c   :  { %v1104_v6 = vpop.permute.xlu0 %1103 }
 0xa0d   :  { %v1106_v7 = vadd.f32 %v1104_v6, %v1096_v5 }
 0xa0f   :  { %1878 = vtanh.f32 %v1106_v7 }
 0xa1c   :  { %v1879_v8 = vpop.eup %1878 }
 0xa1d   :  { %1109 = vrot.lane.b32.xlu1 %v1879_v8, %s2047_s22 }
 0xa8f   :  { %v1110_v10 = vpop.permute.xlu1 %1109 }
 0xa90   :  { %v2307_v12 = vmul.f32 %v1877_v4, %v1110_v10 }
 0xa92   :  { %1114 = vrot.lane.b32.xlu0 %v2307_v12, %s2048_s25 }
 0xb04   :  { %v1115_v14 = vpop.permute.xlu0 %1114 }
 0xb05   :  { %1800 = vmatmul.mubr.msk.f32.vlgmr.msra.gmra.mxu0 %vm710_vm3, %v1115_v14 }
 0xb06   :  { %1814 = vmatpush3.msra.mxu0 %v2148_v19  ;;  %1821 = vmatprep.mubr.msk.f32.mxu0 %vm2046_vm0, %v2045_v0 }
 0xb07   :  { %1815 = vmatprep.subr.mxu0 %v2045_v0 }
 0xb08   :  { %1816 = vmatpush3.msra.mxu0 %v2153_v20 }
 0xb09   :  { %1817 = vmatprep.subr.mxu0 %v2045_v0 }
 0xb0a   :  { %1818 = vmatpush3.msra.mxu0 %v2159_v21 }
 0xb0b   :  { %1819 = vmatprep.subr.mxu0 %v2045_v0 }
 0xb0c   :  { %1820 = vmatpush3.msra.mxu0 %v2163_v22 }
 0xbc5   :  { %v1184_v16 = vpop.f32.mrf.mxu0 }
 0xbc6   :  { %v1188_v17 = vadd.f32 %v1184_v16, %v471_v15 }
 0xbc7   :  { %v1801_v18 = vpop.f32.mrf.mxu0 }
 0xbc8   :  { %1880 = vtanh.f32 %v1188_v17  ;;  %v1619_v24 = vmul.f32 -1.442695, %v1188_v17 }
 0xbca   :  { %1882 = vpow2.f32 %v1619_v24 }
 0xbd5   :  { %v1881_v23 = vpop.eup %1880 }
 0xbd6   :  { %1198 = vrot.lane.b32.xlu1 %v1881_v23, %s2047_s22 }
 0xbd7   :  { %v1883_v25 = vpop.eup %1882 }
 0xbd8   :  { %v1192_v27 = vadd.f32 1.0, %v1883_v25 }
 0xbda   :  { %1884 = vrcp.f32 %v1192_v27 }
 0xbe7   :  { %v1885_v29 = vpop.eup %1884 }
 0xbe8   :  { %v1196_v34 = vmul.f32 %v1885_v29, %v1106_v7  ;;  %v705_v7 = vadd.f32 %v2192_v32, %v2246_v11 }
 0xc48   :  { %v1199_v31 = vpop.permute.xlu1 %1198 }
 0xc49   :  { %v1201_v33 = vmul.f32 %v1885_v29, %v1199_v31 }
 0xc4b   :  { %1203 = vrot.lane.b32.xlu0 %v1201_v33, %s2048_s25 }
 0xcbd   :  { %v1204_v35 = vpop.permute.xlu0 %1203 }
 0xcbe   :  { %v1206_v28 = vadd.f32 %v1204_v35, %v1196_v34 }
 0xcc0   :  { %1886 = vtanh.f32 %v1206_v28 }
 0xccd   :  { %v1887_v36 = vpop.eup %1886 }
 0xcce   :  { %1209 = vrot.lane.b32.xlu1 %v1887_v36, %s2047_s22 }
 0xd40   :  { %v1210_v37 = vpop.permute.xlu1 %1209 }
 0xd41   :  { %v1212_v39 = vmul.f32 %v1885_v29, %v1210_v37 }
 0xd43   :  { %1214 = vrot.lane.b32.xlu0 %v1212_v39, %s2048_s25 }
 0xdb5   :  { %v2327_v40 = vpop.permute.xlu0 %1214 }
 0xdb6   :  { %1811 = vmatmul.mubr.msk.f32.vlgmr.msra.gmra.mxu1 %vm710_vm3, %v2327_v40 }
 0xdb7   :  { %1825 = vmatpush3.msra.mxu1 %v2148_v19  ;;  %1832 = vmatprep.mubr.msk.f32.mxu1 %vm2046_vm0, %v2045_v0 }
 0xdb8   :  { %1826 = vmatprep.subr.mxu1 %v2045_v0 }
 0xdb9   :  { %1827 = vmatpush3.msra.mxu1 %v2153_v20 }
 0xdba   :  { %1828 = vmatprep.subr.mxu1 %v2045_v0 }
 0xdbb   :  { %1829 = vmatpush3.msra.mxu1 %v2159_v21 }
 0xdbc   :  { %1830 = vmatprep.subr.mxu1 %v2045_v0 }
 0xdbd   :  { %1831 = vmatpush3.msra.mxu1 %v2163_v22 }
 0xe76   :  { %v1284_v42 = vpop.f32.mrf.mxu1 }
 0xe77   :  { %v1288_v19 = vadd.f32 %v1284_v42, %v549_v41 }
 0xe78   :  { %v1812_v43 = vpop.f32.mrf.mxu1 }
 0xe79   :  { %1888 = vtanh.f32 %v1288_v19  ;;  %v1621_v45 = vmul.f32 -1.442695, %v1288_v19 }
 0xe7b   :  { %1890 = vpow2.f32 %v1621_v45 }
 0xe86   :  { %v1889_v44 = vpop.eup %1888 }
 0xe87   :  { %1298 = vrot.lane.b32.xlu1 %v1889_v44, %s2047_s22 }
 0xe88   :  { %v1891_v20 = vpop.eup %1890 }
 0xe89   :  { %v1292_v46 = vadd.f32 1.0, %v1891_v20 }
 0xe8b   :  { %1892 = vrcp.f32 %v1292_v46 }
 0xe98   :  { %v1893_v21 = vpop.eup %1892 }
 0xe99   :  { %v1296_v22 = vmul.f32 %v1893_v21, %v1206_v28 }
 0xef9   :  { %v1299_v47 = vpop.permute.xlu1 %1298 }
 0xefa   :  { %v1301_v0 = vmul.f32 %v1893_v21, %v1299_v47 }
 0xefc   :  { %1303 = vrot.lane.b32.xlu0 %v1301_v0, %s2048_s25 }
 0xf6e   :  { %v1304_v48 = vpop.permute.xlu0 %1303 }
 0xf6f   :  { %v1306_v9 = vadd.f32 %v1304_v48, %v1296_v22 }
 0xf71   :  { %1894 = vtanh.f32 %v1306_v9 }
 0xf7e   :  { %v1895_v49 = vpop.eup %1894 }
 0xf7f   :  { %1309 = vrot.lane.b32.xlu1 %v1895_v49, %s2047_s22 }
 0xff1   :  { %v1310_v50 = vpop.permute.xlu1 %1309 }
 0xff2   :  { %v1312_v51 = vmul.f32 %v1893_v21, %v1310_v50 }
 0xff4   :  { %1314 = vrot.lane.b32.xlu0 %v1312_v51, %s2048_s25 }
0x1066   :  { %v1315_v52 = vpop.permute.xlu0 %1314 }
0x1067   :  { %1822 = vmatmul.mubr.msk.f32.vlgmr.msra.gmra.mxu0 %vm710_vm3, %v1315_v52 }
0x1127   :  { %v1384_v53 = vpop.f32.mrf.mxu0 }
0x1128   :  { %v1388_v54 = vadd.f32 %v1384_v53, %v627_v26 }
0x1129   :  { %v1823_v56 = vpop.f32.mrf.mxu0 }
0x112a   :  { %1896 = vtanh.f32 %v1388_v54  ;;  %v1623_v58 = vmul.f32 -1.442695, %v1388_v54 }
0x112c   :  { %1898 = vpow2.f32 %v1623_v58 }
0x1137   :  { %v1897_v57 = vpop.eup %1896 }
0x1138   :  { %1398 = vrot.lane.b32.xlu1 %v1897_v57, %s2047_s22 }
0x1139   :  { %v1899_v59 = vpop.eup %1898 }
0x113a   :  { %v1392_v60 = vadd.f32 1.0, %v1899_v59 }
0x113c   :  { %1900 = vrcp.f32 %v1392_v60 }
0x1149   :  { %v1901_v61 = vpop.eup %1900 }
0x114a   :  { %v1396_v3 = vmul.f32 %v1901_v61, %v1306_v9 }
0x11aa   :  { %v1399_v62 = vpop.permute.xlu1 %1398 }
0x11ab   :  { %v1401_v63 = vmul.f32 %v1901_v61, %v1399_v62 }
0x11ad   :  { %1403 = vrot.lane.b32.xlu0 %v1401_v63, %s2048_s25 }
0x121f   :  { %v1404_v4 = vpop.permute.xlu0 %1403 }
0x1220   :  { %v1406_v30 = vadd.f32 %v1404_v4, %v1396_v3 }
0x1222   :  { %1902 = vtanh.f32 %v1406_v30 }
0x122f   :  { %v1903_v1 = vpop.eup %1902 }
0x1230   :  { %1409 = vrot.lane.b32.xlu1 %v1903_v1, %s2047_s22 }
0x12a2   :  { %v1410_v2 = vpop.permute.xlu1 %1409 }
0x12a3   :  { %v1412_v5 = vmul.f32 %v1901_v61, %v1410_v2 }
0x12a5   :  { %1414 = vrot.lane.b32.xlu0 %v1412_v5, %s2048_s25 }
0x1317   :  { %v1415_v6 = vpop.permute.xlu0 %1414 }
0x1318   :  { %1833 = vmatmul.mubr.msk.f32.vlgmr.msra.gmra.mxu1 %vm710_vm3, %v1415_v6 }
0x13d8   :  { %v1484_v8 = vpop.f32.mrf.mxu1 }
0x13d9   :  { %v1488_v10 = vadd.f32 %v1484_v8, %v705_v7 }
0x13da   :  { %v1834_v14 = vpop.f32.mrf.mxu1 }
0x13db   :  { %1904 = vtanh.f32 %v1488_v10  ;;  %v1625_v16 = vmul.f32 -1.442695, %v1488_v10 }
0x13dd   :  { %1906 = vpow2.f32 %v1625_v16 }
0x13e8   :  { %v1905_v15 = vpop.eup %1904 }
0x13e9   :  { %1498 = vrot.lane.b32.xlu1 %v1905_v15, %s2047_s22 }
0x13ea   :  { %v1907_v17 = vpop.eup %1906 }
0x13eb   :  { %v1492_v18 = vadd.f32 1.0, %v1907_v17 }
0x13ed   :  { %1908 = vrcp.f32 %v1492_v18 }
0x13fa   :  { %v1909_v23 = vpop.eup %1908 }
0x13fb   :  { %v1496_v32 = vmul.f32 %v1909_v23, %v1406_v30 }
0x145b   :  { %v1499_v24 = vpop.permute.xlu1 %1498 }
0x145c   :  { %v1501_v25 = vmul.f32 %v1909_v23, %v1499_v24 }
0x145e   :  { %1503 = vrot.lane.b32.xlu0 %v1501_v25, %s2048_s25 }
0x1462   :  { %1514 = vrot.lane.b32.xlu0 %v2267_v38, %s2047_s22 }
0x1466   :  { %1517 = vrot.lane.b32.xlu0 %v2287_v55, %s2049_s3 }
0x14d0   :  { %v1504_v11 = vpop.permute.xlu0 %1503 }
0x14d1   :  { %v1506_v27 = vadd.f32 %v1504_v11, %v1496_v32 }
0x14d3   :  { %1910 = vtanh.f32 %v1506_v27 }
0x14d4   :  { %v1515_v31 = vpop.permute.xlu0 %1514 }
0x14d5   :  { %v1527_v55 = vsel %vm710_vm3, %v2248_v13, %v1515_v31 }
0x14d8   :  { %v1518_v38 = vpop.permute.xlu0 %1517 }
0x14d9   :  { %v1529_v28 = vsel %vm1528_vm4, %v1527_v55, %v1518_v38 }
0x14da   :  { %v1531_v41 = vsel %vm1530_vm5, %v1529_v28, %v2307_v12 }
0x14e0   :  { %v1911_v29 = vpop.eup %1910 }
0x14e1   :  { %1509 = vrot.lane.b32.xlu1 %v1911_v29, %s2047_s22 }
0x14e5   :  { %1521 = vrot.lane.b32.xlu1 %v1312_v51, %s2047_s22 }
0x14e9   :  { %1524 = vrot.lane.b32.xlu1 %v1412_v5, %s2049_s3 }
0x14ed   :  { %1554 = vrot.lane.b32.xlu1 %v1506_v27, %s2049_s3 }
0x1553   :  { %v1510_v33 = vpop.permute.xlu1 %1509 }
0x1554   :  { %v1512_v34 = vmul.f32 %v1909_v23, %v1510_v33 }
0x1556   :  { %1548 = vrot.lane.b32.xlu0 %v1512_v34, %s2048_s25 }
0x1557   :  { %v1522_v35 = vpop.permute.xlu1 %1521 }
0x1558   :  { %v1532_v36 = vsel %vm710_vm3, %v2327_v40, %v1522_v35 }
0x155b   :  { %v1525_v37 = vpop.permute.xlu1 %1524 }
0x155c   :  { %v1533_v39 = vsel %vm1528_vm4, %v1532_v36, %v1525_v37 }
0x155d   :  { %v1534_v42 = vsel %vm1530_vm5, %v1533_v39, %v1512_v34 }
0x155e   :  { %v1537_v19 = vcombine.low %v1531_v41, %v1534_v42 }
0x155f   :  { %v1555_v43 = vpop.permute.xlu1 %1554 }
0x1560   :  { %1557 = vst.msk [vmem:[#allocation11] sm:$0x3] %vm1551_vm6, %v1555_v43  ;;  %1626 = vst.sshfl [vmem:[#allocation8] sm:$0x33 pattern:$0x76325410] %v1537_v19 }
0x1561   :  { %1983 = shalt.err (!%p1980_p5)
}
0x1562   :  { %1567 = dma.vmem_to_hbm [thread:$0]  %s1565_s26, 64, %s2386_s6, [#allocation4]  }
0x1563   :  { %s2051_s30 = smov [#allocation9]   ;;  %s2052_s10 = smov [#allocation11]  }
0x1564   :  { %s1574_s9 = sshll.u32 %s2051_s30, 4  ;;  %s1584_s11 = sshll.u32 %s2052_s10, 4  ;;  %s1575_s9 = int_to_ptr.vmem [resolvable:$true] %s1574_s9  ;;  %s1585_s11 = int_to_ptr.vmem [resolvable:$true] %s1584_s11 }
0x1565   :  { %s1992_s12 = scalar_lea.vmem %s1575_s9, 32  ;;  %p1997_p7 = scmp.lt.s32.totalorder %s1575_s9, %s1575_s9 }
0x1566   :  { %p1993_p6 = scmp.ne.s32.totalorder %s1575_s9, %s1992_s12  ;;  %p1998_p8 = scmp.lt.s32.totalorder %s1992_s12, %s1992_s12 }
0x1568   :  { %p1999_p9 = por %p1998_p8, %p1997_p7 }
0x156a   :  { %p2000_p10 = pnand %p1999_p9, %p1993_p6 }
0x15c8   :  { %v1549_v13 = vpop.permute.xlu0 %1548 }
0x15c9   :  { %1552 = vst.msk [vmem:[#allocation9] sm:$0x3] %vm1551_vm6, %v1549_v13 }
0x15ca   :  { %2003 = shalt.err (!%p2000_p10)
}
0x15cb   :  { %1577 = dma.vmem_to_hbm [thread:$0]  %s1575_s9, 32, %s2387_s7, [#allocation10]  }
0x15cc   :  { %s2012_s6 = scalar_lea.vmem %s1585_s11, 32  ;;  %p2017_p12 = scmp.lt.s32.totalorder %s1585_s11, %s1585_s11 }
0x15cd   :  { %p2013_p11 = scmp.ne.s32.totalorder %s1585_s11, %s2012_s6  ;;  %p2018_p13 = scmp.lt.s32.totalorder %s2012_s6, %s2012_s6 }
0x15cf   :  { %p2019_p0 = por %p2018_p13, %p2017_p12 }
0x15d1   :  { %p2020_p1 = pnand %p2019_p0, %p2013_p11 }
0x15d3   :  { %2023 = shalt.err (!%p2020_p1)
}
0x15d4   :  { %1587 = dma.vmem_to_hbm [thread:$0]  %s1585_s11, 32, %s2388_s8, [#allocation10]  }
0x15d5   :  { %2036 = dma.done.wait [#allocation4], 64  }
0x15d6   :  { %2037 = vsyncadd [#allocation4], 4294967232 }
0x15d7   :  { %2038 = dma.done.wait [#allocation10], 64  }
0x15d8   :  { %2039 = vsyncadd [#allocation10], 4294967232 }
0x15d9   :  { %1597 = vsyncpa [#allocation3], 1 }
0x15da   :  { %1598 = vsyncpa [#allocation6], 1 }
0x15db   :  { %1599 = vsyncpa [#allocation4], 1 }
0x15dc   :  { %1600 = vsyncpa [#allocation10], 1 }

</bundles_post_ra>
